<compile_context>
chip_gen: v5e
topology: v5e:2x2
jax: 0.10.0
libtpu: 0.0.40
codegen_flags: <defaults>
</compile_context>

<pallas_src>
import math
from functools import partial

import jax
import jax.numpy as jnp
from jax import lax
from jax.experimental import pallas as pl
from jax.experimental.pallas import tpu as pltpu


# ktab[r][da] -> kernel tap index used for output-row parity r and in-patch
# row offset da (same table for columns). Derived from
#   out[2i+r] += x[i + r + da - 1] * w[ktab[r][da]]   (stride 2, pad 1, k=4)
_KTAB = ((3, 1), (2, 0))


def _round_up(x, m):
    return (x + m - 1) // m * m


def _fused_weight(weight, lhs_dtype):
    """PyTorch ConvTranspose2d weight [Cin, Cout, 4, 4] -> fused [9, 4*Cout, Cin].

    Tap k = dy*3 + dx (3x3 neighbourhood in the 1-padded input),
    row  p = (2r + s)*Cout + co (output parity (r, s) and output channel),
    col  ci = input channel. Taps outside a parity's 2x2 window are zero.
    """
    Cin, Cout = weight.shape[0], weight.shape[1]
    zero = jnp.zeros((Cout, Cin), dtype=weight.dtype)
    taps = []
    for dy in range(3):
        for dx in range(3):
            rows = []
            for r in (0, 1):
                for s in (0, 1):
                    da, db = dy - r, dx - s
                    if 0 <= da <= 1 and 0 <= db <= 1:
                        rows.append(jnp.transpose(
                            weight[:, :, _KTAB[r][da], _KTAB[s][db]]))  # [Cout, Cin]
                    else:
                        rows.append(zero)
            taps.append(jnp.concatenate(rows, axis=0))                   # [4*Cout, Cin]
    return jnp.stack(taps, axis=0).astype(lhs_dtype)                     # [9, 4*Cout, Cin]


def _final_block_kernel(w_ref, x_ref, o_ref, *, wp2, lout, lc):
    # w_ref: [9, 4*Cout, Cin]   resident weights (one tap per leading index)
    # x_ref: [Cin, Lslab]       padded image rows flattened onto lanes
    # o_ref: [4*Cout, Lout]     lane-dense output (Lout multiple of lc)
    offs = tuple(dy * wp2 + dx for dy in range(3) for dx in range(3))
    w_taps = [w_ref[k] for k in range(9)]          # 9 tiny [4*Cout, Cin] tiles
    nck = lout // lc
    for c in range(nck):                           # static unroll, lane-chunked
        base = c * lc
        acc = None
        for k, off in enumerate(offs):
            rhs = x_ref[:, base + off:base + off + lc]      # static lane shift
            d = jnp.dot(w_taps[k], rhs, preferred_element_type=jnp.float32)
            acc = d if acc is None else acc + d
        o_ref[:, base:base + lc] = acc.astype(o_ref.dtype)


def final_block_forward(x, weight, *, stream_bf16=False, out_dtype=None,
                        vmem_budget_mib=8, max_chunks=32):
    """Forward pass of Final_block.

    x:      [N, Cin, H, W]   (NCHW, as in PyTorch)
    weight: [Cin, 3, 4, 4]   (PyTorch ConvTranspose2d weight layout)
    returns [N, 3, 2H, 2W]

    stream_bf16 / out_dtype=bf16 halve HBM traffic but loosen tolerance.
    vmem_budget_mib sizes the per-step tiles (fits v5e/v6e/v7x scoped VMEM).
    """
    N, Cin, H, W = x.shape
    Cout = weight.shape[1]
    P = 4 * Cout          # 4 parities x Cout output channels
    Wp2 = W + 2

    lhs_dtype = jnp.bfloat16 if stream_bf16 else x.dtype
    out_dtype = x.dtype if out_dtype is None else out_dtype
    in_sz = jnp.dtype(lhs_dtype).itemsize
    out_sz = jnp.dtype(out_dtype).itemsize

    # Lane-chunk size for the in-kernel accumulation (multiple of 256 for the
    # v6e/v7x 256-wide MXU result tiles; smaller for big Cin to limit vregs).
    LC = 512 if Cin <= 16 else 256

    # ---- Tile sizing from an explicit VMEM budget -------------------------
    # Per-step live bytes ~ double-buffered slab + double-buffered output +
    # resident weights (+ halo slack of the slab).
    budget = int(vmem_budget_mib) << 20
    per_lane = 2 * Cin * in_sz + 2 * P * out_sz
    fixed = 9 * P * Cin * in_sz + 2 * Cin * (2 * Wp2 + 2 + 128) * in_sz
    lmax = max(LC, (budget - fixed) // per_lane)
    lmax = min(lmax, max_chunks * LC)          # bound the static unroll
    lmax = max(LC, (lmax // LC) * LC)

    TH = max(1, min(H, lmax // Wp2))           # image rows per grid step
    T = -(-H // TH)
    if N * T < 2 and H >= 2:                   # keep both v7x TensorCores busy
        T = 2
        TH = -(-H // 2)
    Hp = T * TH

    Lout = _round_up(TH * Wp2, LC)             # lane-dense output width / step
    Lslab = _round_up(Lout + 2 * Wp2 + 2, 128) # must cover max tap slice end

    # ---- Wrapper staging: zero-pad + flatten (single fusible XLA pass) ----
    x_p = jnp.pad(x, ((0, 0), (0, 0), (1, 1 + Hp - H), (1, 1)))  # [N,Cin,Hp+2,Wp2]
    if T == 1:
        slabs = x_p[:, None]                                     # [N,1,Cin,TH+2,Wp2]
    else:
        slabs = jnp.stack(
            [x_p[:, :, t * TH:t * TH + TH + 2] for t in range(T)], axis=1)
    slabs = slabs.reshape(N * T, Cin, (TH + 2) * Wp2)
    slabs = jnp.pad(
        slabs, ((0, 0), (0, 0), (0, Lslab - (TH + 2) * Wp2))).astype(lhs_dtype)

    wmat = _fused_weight(weight, lhs_dtype)                       # [9, P, Cin]

    kernel = partial(_final_block_kernel, wp2=Wp2, lout=Lout, lc=LC)

    cost = pl.CostEstimate(
        flops=int(2 * (N * T) * P * (9 * Cin) * Lout),
        transcendentals=0,
        bytes_accessed=int(slabs.size * slabs.dtype.itemsize
                           + wmat.size * wmat.dtype.itemsize
                           + (N * T) * P * Lout * out_sz),
    )

    out = pl.pallas_call(
        kernel,
        out_shape=jax.ShapeDtypeStruct((N * T, P, Lout), out_dtype),
        grid_spec=pltpu.PrefetchScalarGridSpec(
            num_scalar_prefetch=0,
            grid=(N * T,),
            in_specs=[
                # Weights: tiny, full-array block, constant index map -> resident.
                pl.BlockSpec((9, P, Cin), lambda g: (0, 0, 0)),
                # One padded/flattened image row-tile per grid step.
                pl.BlockSpec((None, Cin, Lslab), lambda g: (g, 0, 0)),
            ],
            out_specs=pl.BlockSpec((None, P, Lout), lambda g: (g, 0, 0)),
        ),
        compiler_params=pltpu.CompilerParams(
            dimension_semantics=("parallel",)),
        cost_estimate=cost,
    )(wmat, slabs)

    # Pixel-shuffle reassembly:
    #   out[g = n*T + t, (2r+s)*Cout + co, li*Wp2 + j] -> y[n, co, 2*(t*TH+li)+r, 2j+s]
    # TODO(synk): this transpose is one extra pass over the output; an in-kernel
    #   column-parity interleave would make it a cheap major-dim rearrangement.
    y = out[:, :, :TH * Wp2]
    y = y.reshape(N, T, 2, 2, Cout, TH, Wp2)[..., :W]   # drop pad columns
    y = jnp.transpose(y, (0, 4, 1, 5, 2, 6, 3))         # (n, co, t, li, r, j, s)
    y = y.reshape(N, Cout, 2 * Hp, 2 * W)
    return y[:, :, :2 * H, :]                           # drop padded rows


def _reference(x, weight):
    """Transposed conv via dilated standard conv (correctness check)."""
    w_conv = jnp.transpose(weight, (1, 0, 2, 3))[:, :, ::-1, ::-1]  # OIHW, flipped
    return lax.conv_general_dilated(
        x, w_conv,
        window_strides=(1, 1),
        padding=[(2, 2), (2, 2)],     # k - 1 - p = 2
        lhs_dilation=(2, 2),          # stride of the transposed conv
        dimension_numbers=("NCHW", "OIHW", "NCHW"),
    )


if __name__ == "__main__":
    N, Cin, H, W = 2, 4, 16, 16       # output will be [2, 3, 32, 32]
    key = jax.random.PRNGKey(0)
    kx, kw = jax.random.split(key)

    x = jax.random.normal(kx, (N, Cin, H, W), dtype=jnp.float32)
    fan = Cin * 4 * 4
    weight = jax.random.normal(kw, (Cin, 3, 4, 4), dtype=jnp.float32) / math.sqrt(fan)

    y = jax.block_until_ready(final_block_forward(x, weight))

    y_ref = _reference(x, weight)
    assert y.shape == (N, 3, 2 * H, 2 * W), y.shape
    max_err = float(jnp.max(jnp.abs(y - y_ref)))
    assert jnp.allclose(y, y_ref, atol=1e-4, rtol=1e-4), max_err

    print("KERNEL_OK")
</pallas_src>

<mosaic_0001>
module attributes {stable_mosaic.version = 11 : i64} {
  func.func @_final_block_kernel(%arg0: i32, %arg1: memref<9x12x4xf32, #tpu.memory_space<vmem>>, %arg2: memref<1x4x640xf32, #tpu.memory_space<vmem>>, %arg3: memref<1x12x512xf32, #tpu.memory_space<vmem>>) attributes {dimension_semantics = [#tpu.dimension_semantics<parallel>], iteration_bounds = array<i64: 2>, scalar_prefetch = 0 : i64, scratch_operands = 0 : i64, tpu.core_type = #tpu.core_type<tc>, window_params = [{pipeline_mode = #tpu.pipeline_mode<synchronous>, transform_indices = @transform_0, window_bounds = array<i64: 9, 12, 4>}, {transform_indices = @transform_1, window_bounds = array<i64: 1, 4, 640>}, {transform_indices = @transform_2, window_bounds = array<i64: 1, 12, 512>}]} {
    %c0 = arith.constant 0 : index
    %c0_0 = arith.constant 0 : index
    %c0_1 = arith.constant 0 : index
    %0 = vector.load %arg1[%c0, %c0_0, %c0_1] : memref<9x12x4xf32, #tpu.memory_space<vmem>>, vector<1x12x4xf32>
    %1 = vector.shape_cast %0 : vector<1x12x4xf32> to vector<12x4xf32>
    %c1 = arith.constant 1 : index
    %c0_2 = arith.constant 0 : index
    %c0_3 = arith.constant 0 : index
    %2 = vector.load %arg1[%c1, %c0_2, %c0_3] : memref<9x12x4xf32, #tpu.memory_space<vmem>>, vector<1x12x4xf32>
    %3 = vector.shape_cast %2 : vector<1x12x4xf32> to vector<12x4xf32>
    %c2 = arith.constant 2 : index
    %c0_4 = arith.constant 0 : index
    %c0_5 = arith.constant 0 : index
    %4 = vector.load %arg1[%c2, %c0_4, %c0_5] : memref<9x12x4xf32, #tpu.memory_space<vmem>>, vector<1x12x4xf32>
    %5 = vector.shape_cast %4 : vector<1x12x4xf32> to vector<12x4xf32>
    %c3 = arith.constant 3 : index
    %c0_6 = arith.constant 0 : index
    %c0_7 = arith.constant 0 : index
    %6 = vector.load %arg1[%c3, %c0_6, %c0_7] : memref<9x12x4xf32, #tpu.memory_space<vmem>>, vector<1x12x4xf32>
    %7 = vector.shape_cast %6 : vector<1x12x4xf32> to vector<12x4xf32>
    %c4 = arith.constant 4 : index
    %c0_8 = arith.constant 0 : index
    %c0_9 = arith.constant 0 : index
    %8 = vector.load %arg1[%c4, %c0_8, %c0_9] : memref<9x12x4xf32, #tpu.memory_space<vmem>>, vector<1x12x4xf32>
    %9 = vector.shape_cast %8 : vector<1x12x4xf32> to vector<12x4xf32>
    %c5 = arith.constant 5 : index
    %c0_10 = arith.constant 0 : index
    %c0_11 = arith.constant 0 : index
    %10 = vector.load %arg1[%c5, %c0_10, %c0_11] : memref<9x12x4xf32, #tpu.memory_space<vmem>>, vector<1x12x4xf32>
    %11 = vector.shape_cast %10 : vector<1x12x4xf32> to vector<12x4xf32>
    %c6 = arith.constant 6 : index
    %c0_12 = arith.constant 0 : index
    %c0_13 = arith.constant 0 : index
    %12 = vector.load %arg1[%c6, %c0_12, %c0_13] : memref<9x12x4xf32, #tpu.memory_space<vmem>>, vector<1x12x4xf32>
    %13 = vector.shape_cast %12 : vector<1x12x4xf32> to vector<12x4xf32>
    %c7 = arith.constant 7 : index
    %c0_14 = arith.constant 0 : index
    %c0_15 = arith.constant 0 : index
    %14 = vector.load %arg1[%c7, %c0_14, %c0_15] : memref<9x12x4xf32, #tpu.memory_space<vmem>>, vector<1x12x4xf32>
    %15 = vector.shape_cast %14 : vector<1x12x4xf32> to vector<12x4xf32>
    %c8 = arith.constant 8 : index
    %c0_16 = arith.constant 0 : index
    %c0_17 = arith.constant 0 : index
    %16 = vector.load %arg1[%c8, %c0_16, %c0_17] : memref<9x12x4xf32, #tpu.memory_space<vmem>>, vector<1x12x4xf32>
    %17 = vector.shape_cast %16 : vector<1x12x4xf32> to vector<12x4xf32>
    %c0_18 = arith.constant 0 : index
    %c0_19 = arith.constant 0 : index
    %c0_20 = arith.constant 0 : index
    %18 = vector.load %arg2[%c0_18, %c0_19, %c0_20] : memref<1x4x640xf32, #tpu.memory_space<vmem>>, vector<1x4x512xf32>
    %19 = vector.shape_cast %18 : vector<1x4x512xf32> to vector<4x512xf32>
    %cst = arith.constant dense<0.000000e+00> : vector<12x512xf32>
    %20 = tpu.matmul %1, %19, %cst {dimension_numbers = #tpu.dot_dimension_numbers<[1], [0], [0], [1], [0, 0, 1, 1], [], []>} : vector<12x4xf32>, vector<4x512xf32>, vector<12x512xf32> -> vector<12x512xf32>
    %c0_21 = arith.constant 0 : index
    %c0_22 = arith.constant 0 : index
    %c1_23 = arith.constant 1 : index
    %21 = vector.load %arg2[%c0_21, %c0_22, %c1_23] : memref<1x4x640xf32, #tpu.memory_space<vmem>>, vector<1x4x512xf32>
    %22 = vector.shape_cast %21 : vector<1x4x512xf32> to vector<4x512xf32>
    %cst_24 = arith.constant dense<0.000000e+00> : vector<12x512xf32>
    %23 = tpu.matmul %3, %22, %cst_24 {dimension_numbers = #tpu.dot_dimension_numbers<[1], [0], [0], [1], [0, 0, 1, 1], [], []>} : vector<12x4xf32>, vector<4x512xf32>, vector<12x512xf32> -> vector<12x512xf32>
    %24 = arith.addf %20, %23 : vector<12x512xf32>
    %c0_25 = arith.constant 0 : index
    %c0_26 = arith.constant 0 : index
    %c2_27 = arith.constant 2 : index
    %25 = vector.load %arg2[%c0_25, %c0_26, %c2_27] : memref<1x4x640xf32, #tpu.memory_space<vmem>>, vector<1x4x512xf32>
    %26 = vector.shape_cast %25 : vector<1x4x512xf32> to vector<4x512xf32>
    %cst_28 = arith.constant dense<0.000000e+00> : vector<12x512xf32>
    %27 = tpu.matmul %5, %26, %cst_28 {dimension_numbers = #tpu.dot_dimension_numbers<[1], [0], [0], [1], [0, 0, 1, 1], [], []>} : vector<12x4xf32>, vector<4x512xf32>, vector<12x512xf32> -> vector<12x512xf32>
    %28 = arith.addf %24, %27 : vector<12x512xf32>
    %c0_29 = arith.constant 0 : index
    %c0_30 = arith.constant 0 : index
    %c18 = arith.constant 18 : index
    %29 = vector.load %arg2[%c0_29, %c0_30, %c18] : memref<1x4x640xf32, #tpu.memory_space<vmem>>, vector<1x4x512xf32>
    %30 = vector.shape_cast %29 : vector<1x4x512xf32> to vector<4x512xf32>
    %cst_31 = arith.constant dense<0.000000e+00> : vector<12x512xf32>
    %31 = tpu.matmul %7, %30, %cst_31 {dimension_numbers = #tpu.dot_dimension_numbers<[1], [0], [0], [1], [0, 0, 1, 1], [], []>} : vector<12x4xf32>, vector<4x512xf32>, vector<12x512xf32> -> vector<12x512xf32>
    %32 = arith.addf %28, %31 : vector<12x512xf32>
    %c0_32 = arith.constant 0 : index
    %c0_33 = arith.constant 0 : index
    %c19 = arith.constant 19 : index
    %33 = vector.load %arg2[%c0_32, %c0_33, %c19] : memref<1x4x640xf32, #tpu.memory_space<vmem>>, vector<1x4x512xf32>
    %34 = vector.shape_cast %33 : vector<1x4x512xf32> to vector<4x512xf32>
    %cst_34 = arith.constant dense<0.000000e+00> : vector<12x512xf32>
    %35 = tpu.matmul %9, %34, %cst_34 {dimension_numbers = #tpu.dot_dimension_numbers<[1], [0], [0], [1], [0, 0, 1, 1], [], []>} : vector<12x4xf32>, vector<4x512xf32>, vector<12x512xf32> -> vector<12x512xf32>
    %36 = arith.addf %32, %35 : vector<12x512xf32>
    %c0_35 = arith.constant 0 : index
    %c0_36 = arith.constant 0 : index
    %c20 = arith.constant 20 : index
    %37 = vector.load %arg2[%c0_35, %c0_36, %c20] : memref<1x4x640xf32, #tpu.memory_space<vmem>>, vector<1x4x512xf32>
    %38 = vector.shape_cast %37 : vector<1x4x512xf32> to vector<4x512xf32>
    %cst_37 = arith.constant dense<0.000000e+00> : vector<12x512xf32>
    %39 = tpu.matmul %11, %38, %cst_37 {dimension_numbers = #tpu.dot_dimension_numbers<[1], [0], [0], [1], [0, 0, 1, 1], [], []>} : vector<12x4xf32>, vector<4x512xf32>, vector<12x512xf32> -> vector<12x512xf32>
    %40 = arith.addf %36, %39 : vector<12x512xf32>
    %c0_38 = arith.constant 0 : index
    %c0_39 = arith.constant 0 : index
    %c36 = arith.constant 36 : index
    %41 = vector.load %arg2[%c0_38, %c0_39, %c36] : memref<1x4x640xf32, #tpu.memory_space<vmem>>, vector<1x4x512xf32>
    %42 = vector.shape_cast %41 : vector<1x4x512xf32> to vector<4x512xf32>
    %cst_40 = arith.constant dense<0.000000e+00> : vector<12x512xf32>
    %43 = tpu.matmul %13, %42, %cst_40 {dimension_numbers = #tpu.dot_dimension_numbers<[1], [0], [0], [1], [0, 0, 1, 1], [], []>} : vector<12x4xf32>, vector<4x512xf32>, vector<12x512xf32> -> vector<12x512xf32>
    %44 = arith.addf %40, %43 : vector<12x512xf32>
    %c0_41 = arith.constant 0 : index
    %c0_42 = arith.constant 0 : index
    %c37 = arith.constant 37 : index
    %45 = vector.load %arg2[%c0_41, %c0_42, %c37] : memref<1x4x640xf32, #tpu.memory_space<vmem>>, vector<1x4x512xf32>
    %46 = vector.shape_cast %45 : vector<1x4x512xf32> to vector<4x512xf32>
    %cst_43 = arith.constant dense<0.000000e+00> : vector<12x512xf32>
    %47 = tpu.matmul %15, %46, %cst_43 {dimension_numbers = #tpu.dot_dimension_numbers<[1], [0], [0], [1], [0, 0, 1, 1], [], []>} : vector<12x4xf32>, vector<4x512xf32>, vector<12x512xf32> -> vector<12x512xf32>
    %48 = arith.addf %44, %47 : vector<12x512xf32>
    %c0_44 = arith.constant 0 : index
    %c0_45 = arith.constant 0 : index
    %c38 = arith.constant 38 : index
    %49 = vector.load %arg2[%c0_44, %c0_45, %c38] : memref<1x4x640xf32, #tpu.memory_space<vmem>>, vector<1x4x512xf32>
    %50 = vector.shape_cast %49 : vector<1x4x512xf32> to vector<4x512xf32>
    %cst_46 = arith.constant dense<0.000000e+00> : vector<12x512xf32>
    %51 = tpu.matmul %17, %50, %cst_46 {dimension_numbers = #tpu.dot_dimension_numbers<[1], [0], [0], [1], [0, 0, 1, 1], [], []>} : vector<12x4xf32>, vector<4x512xf32>, vector<12x512xf32> -> vector<12x512xf32>
    %52 = arith.addf %48, %51 : vector<12x512xf32>
    %c0_47 = arith.constant 0 : index
    %c0_48 = arith.constant 0 : index
    %c0_49 = arith.constant 0 : index
    %53 = vector.load %arg3[%c0_47, %c0_48, %c0_49] : memref<1x12x512xf32, #tpu.memory_space<vmem>>, vector<1x12x512xf32>
    %54 = vector.shape_cast %53 : vector<1x12x512xf32> to vector<12x512xf32>
    %55 = vector.shape_cast %52 : vector<12x512xf32> to vector<1x12x512xf32>
    tpu.vector_store %arg3[%c0_47, %c0_48, %c0_49], %55 {strides = array<i32>} : memref<1x12x512xf32, #tpu.memory_space<vmem>>, vector<1x12x512xf32>,
    return
  }
  func.func @transform_0(%arg0: i32) -> (i32, i32, i32) {
    %c0_i32 = arith.constant 0 : i32
    %c0_i32_0 = arith.constant 0 : i32
    %c0_i32_1 = arith.constant 0 : i32
    %c0_i32_2 = arith.constant 0 : i32
    return %c0_i32, %c0_i32_0, %c0_i32_1 : i32, i32, i32
  }
  func.func @transform_1(%arg0: i32) -> (i32, i32, i32) {
    %c0_i32 = arith.constant 0 : i32
    %c0_i32_0 = arith.constant 0 : i32
    %c0_i32_1 = arith.constant 0 : i32
    return %arg0, %c0_i32, %c0_i32_0 : i32, i32, i32
  }
  func.func @transform_2(%arg0: i32) -> (i32, i32, i32) {
    %c0_i32 = arith.constant 0 : i32
    %c0_i32_0 = arith.constant 0 : i32
    %c0_i32_1 = arith.constant 0 : i32
    return %arg0, %c0_i32, %c0_i32_0 : i32, i32, i32
  }
}

</mosaic_0001>

<bundles_post_ra>
// kernel: tpu_custom_call.1
= control target key start
LH: loop header
LB: loop body
LE: loop exit
PB: predicated region body
PF: predicated region fallthrough
CT: control target
= control target key end

     0   :  { %s1687_s9 = smov 0   ;;  %s1955_s0 = inlined_call_operand.vmem [shape: f32[9,12,4], index: 0, kind: input, shape index: {}]   ;;  %s1956_s1 = inlined_call_operand.vmem [shape: f32[2,4,640], index: 1, kind: input, shape index: {}]   ;;  %s1957_s2 = inlined_call_operand.vmem [shape: f32[2,12,512], index: 2, kind: output, shape index: {}]  }
   0x1 LB: > { %s1504_s10 = sadd.s32 4294967295, %s1662_s9   ;;  %p1508_p0 = scmp.ge.s32.totalorder %s1662_s9, 1  ;;  %s1662_s9 = sphi %s1687_s9, %s12_s9  }
   0x2   : > { %p112_p1 = scmp.lt.s32.totalorder %s1662_s9, 3 }
   0x4   : > { %p113_p2 = pnand %p1508_p0, %p112_p1 }
   0x5   : > { %p134_p3 = scmp.lt.s32.totalorder (!%p113_p2), %s1504_s10, 1  ;;  %s1664_s15 = smov (!%p113_p2), 127  }
   0x6   : > { %116 = sbr.rel (%p113_p2) target bundleno = 423 (0x1a7), region = 28  ;;  %s1665_s16 = smov (!%p113_p2), 126  }
   0x7   : > { %s1666_s17 = smov (!%p113_p2), 110   ;;  %s1667_s18 = smov (!%p113_p2), 109  }
   0x8   : > { %s1668_s19 = smov (!%p113_p2), 108   ;;  %s1669_s20 = smov (!%p113_p2), 92  }
   0x9   : > { %s1670_s21 = smov (!%p113_p2), 91   ;;  %s1671_s22 = smov (!%p113_p2), 90  }
   0xb   : > { %s1959_s10 = smov (!%p134_p3, %s1504_s10), 1  ;;  %vm198_vm0 = vcmask 1039360   ;;  %vm210_vm1 = vcmask 1043456   ;;  %v1512_v57 = vld [vmem:[%s1955_s0 + $0x10] sm:$0xff]  ;;  %vm203_vm2 = vcmask 31744   ;;  %vm452_vm3 = vcmask 1031168  }
   0xc   : > { %s1639_s11 = smul.u32 20, %s1959_s10  ;;  %vm597_vm4 = vcmask 900096   ;;  %vm742_vm5 = vcmask 891904   ;;  %vm887_vm6 = vcmask 883712   ;;  %vm1032_vm7 = vcmask 752640   ;;  %s1638_s5 = sshll.u32 %s1959_s10, 6 }
   0xd   : > { %vm1177_vm8 = vcmask 744448   ;;  %vm1322_vm9 = vcmask 736256   ;;  %s1939_s8 = scalar_lea.vmem %s1957_s2, %s1638_s5 }
   0xe   : > { %s1701_s14 = scalar_lea.vmem %s1956_s1, %s1639_s11 }
   0xf   : > { %v174_v0 = vld [vmem:[%s1701_s14 + $0x10] sm:$0xf]  ;;  %v1705_v1 = vld [vmem:[%s1701_s14 + $0x8] sm:$0xff]  ;;  %v1708_v2 = vld [vmem:[%s1701_s14] sm:$0xff] }
  0x10   : > { %182 = vst [vmem:[#allocation1 + $0x20] ss:$2 sm:$0xff] %v174_v0  ;;  %v428_v3 = vld [vmem:[%s1701_s14 + $0x10] sm:$0xf]  ;;  %v1513_v0 = vld [vmem:[%s1955_s0 + $0x18] sm:$0xf] }
  0x11   : > { %180 = vst [vmem:[#allocation1 + $0x10] ss:$2 sm:$0xff] %v1705_v1  ;;  %v573_v9 = vld [vmem:[%s1701_s14 + $0x10] sm:$0xf] }
  0x12   : > { %178 = vst [vmem:[#allocation1] ss:$2 sm:$0xff] %v1708_v2  ;;  %v718_v15 = vld [vmem:[%s1701_s14 + $0x10] sm:$0xf] }
  0x13   : > { %v863_v21 = vld [vmem:[%s1701_s14 + $0x10] sm:$0xf] }
  0x14   : > { %v1008_v27 = vld [vmem:[%s1701_s14 + $0x10] sm:$0xf] }
  0x15   : > { %v1153_v33 = vld [vmem:[%s1701_s14 + $0x10] sm:$0xf] }
  0x16   : > { %v1298_v39 = vld [vmem:[%s1701_s14 + $0x10] sm:$0xf] }
  0x17   : > { %v187_v4 = vld.sshfl [vmem:[#allocation1 + $0x20] sm:$0xff pattern:$0x75316420] }
  0x18   : > { %196 = vrot.lane.b32.xlu1 %v187_v4, %s1664_s15  ;;  %436 = vst [vmem:[#allocation1 + $0x20] ss:$2 sm:$0xff] %v428_v3  ;;  %v185_v5 = vld.sshfl [vmem:[#allocation1 + $0x10] sm:$0xff pattern:$0x75316420] }
  0x19   : > { %192 = vrot.lane.b32.xlu0 %v185_v5, %s1664_s15  ;;  %v186_v6 = vld.sshfl [vmem:[#allocation1 + $0x18] sm:$0xff pattern:$0x75316420]  ;;  %v183_v7 = vld.sshfl [vmem:[#allocation1] sm:$0xff pattern:$0x75316420] }
  0x1a   : > { %315 = vst [vmem:[#allocation1 + $0x10] ss:$2 sm:$0xff] %v1705_v1  ;;  %v184_v8 = vld.sshfl [vmem:[#allocation1 + $0x8] sm:$0xff pattern:$0x75316420]  ;;  %v144_v5 = vld [vmem:[%s1955_s0] sm:$0xff] }
  0x1b   : > { %190 = vrot.lane.b32.xlu2 %v184_v8, %s1664_s15  ;;  %313 = vst [vmem:[#allocation1] ss:$2 sm:$0xff] %v1708_v2 }
  0x1f   : > { %v441_v10 = vld.sshfl [vmem:[#allocation1 + $0x20] sm:$0xff pattern:$0x75316420] }
  0x20   : > { %188 = vrot.lane.b32.xlu1 %v183_v7, %s1664_s15  ;;  %581 = vst [vmem:[#allocation1 + $0x20] ss:$2 sm:$0xff] %v573_v9 }
  0x21   : > { %194 = vrot.lane.b32.xlu0 %v186_v6, %s1664_s15  ;;  %v1716_v11 = vld.sshfl [vmem:[#allocation1 + $0x10] sm:$0xff pattern:$0x75316420]  ;;  %v1718_v12 = vld.sshfl [vmem:[#allocation1 + $0x18] sm:$0xff pattern:$0x75316420] }
  0x22   : > { %434 = vst [vmem:[#allocation1 + $0x10] ss:$2 sm:$0xff] %v1705_v1  ;;  %v1721_v13 = vld.sshfl [vmem:[#allocation1] sm:$0xff pattern:$0x75316420] }
  0x23   : > { %v1723_v14 = vld.sshfl [vmem:[#allocation1 + $0x8] sm:$0xff pattern:$0x75316420] }
  0x24   : > { %432 = vst [vmem:[#allocation1] ss:$2 sm:$0xff] %v1708_v2 }
  0x27   : > { %v586_v16 = vld.sshfl [vmem:[#allocation1 + $0x20] sm:$0xff pattern:$0x75316420] }
  0x28   : > { %450 = vrot.lane.b32.xlu1 %v441_v10, %s1665_s16  ;;  %726 = vst [vmem:[#allocation1 + $0x20] ss:$2 sm:$0xff] %v718_v15 }
  0x29   : > { %v440_v17 = vld.sshfl [vmem:[#allocation1 + $0x18] sm:$0xff pattern:$0x75316420]  ;;  %v439_v18 = vld.sshfl [vmem:[#allocation1 + $0x10] sm:$0xff pattern:$0x75316420] }
  0x2a   : > { %448 = vrot.lane.b32.xlu0 %v440_v17, %s1665_s16  ;;  %579 = vst [vmem:[#allocation1 + $0x10] ss:$2 sm:$0xff] %v1705_v1  ;;  %446 = vrot.lane.b32.xlu2 %v439_v18, %s1665_s16  ;;  %v1514_v18 = vld [vmem:[%s1955_s0 + $0x20] sm:$0xff] }
  0x2b   : > { %v438_v19 = vld.sshfl [vmem:[#allocation1 + $0x8] sm:$0xff pattern:$0x75316420]  ;;  %v437_v20 = vld.sshfl [vmem:[#allocation1] sm:$0xff pattern:$0x75316420] }
  0x2c   : > { %577 = vst [vmem:[#allocation1] ss:$2 sm:$0xff] %v1708_v2 }
  0x2f   : > { %v731_v22 = vld.sshfl [vmem:[#allocation1 + $0x20] sm:$0xff pattern:$0x75316420] }
  0x30   : > { %871 = vst [vmem:[#allocation1 + $0x20] ss:$2 sm:$0xff] %v863_v21 }
  0x31   : > { %v584_v23 = vld.sshfl [vmem:[#allocation1 + $0x10] sm:$0xff pattern:$0x75316420]  ;;  %v585_v24 = vld.sshfl [vmem:[#allocation1 + $0x18] sm:$0xff pattern:$0x75316420] }
  0x32   : > { %444 = vrot.lane.b32.xlu0 %v438_v19, %s1665_s16  ;;  %591 = vrot.lane.b32.xlu1 %v584_v23, %s1666_s17  ;;  %724 = vst [vmem:[#allocation1 + $0x10] ss:$2 sm:$0xff] %v1705_v1 }
  0x33   : > { %v582_v25 = vld.sshfl [vmem:[#allocation1] sm:$0xff pattern:$0x75316420]  ;;  %v583_v26 = vld.sshfl [vmem:[#allocation1 + $0x8] sm:$0xff pattern:$0x75316420]  ;;  %442 = vrot.lane.b32.xlu2 %v437_v20, %s1665_s16 }
  0x34   : > { %722 = vst [vmem:[#allocation1] ss:$2 sm:$0xff] %v1708_v2 }
  0x37   : > { %v876_v28 = vld.sshfl [vmem:[#allocation1 + $0x20] sm:$0xff pattern:$0x75316420] }
  0x38   : > { %1016 = vst [vmem:[#allocation1 + $0x20] ss:$2 sm:$0xff] %v1008_v27 }
  0x39   : > { %v729_v29 = vld.sshfl [vmem:[#allocation1 + $0x10] sm:$0xff pattern:$0x75316420]  ;;  %v730_v30 = vld.sshfl [vmem:[#allocation1 + $0x18] sm:$0xff pattern:$0x75316420] }
  0x3a   : > { %595 = vrot.lane.b32.xlu0 %v586_v16, %s1666_s17  ;;  %587 = vrot.lane.b32.xlu1 %v582_v25, %s1666_s17  ;;  %869 = vst [vmem:[#allocation1 + $0x10] ss:$2 sm:$0xff] %v1705_v1 }
  0x3b   : > { %593 = vrot.lane.b32.xlu2 %v585_v24, %s1666_s17  ;;  %v728_v31 = vld.sshfl [vmem:[#allocation1 + $0x8] sm:$0xff pattern:$0x75316420]  ;;  %v727_v32 = vld.sshfl [vmem:[#allocation1] sm:$0xff pattern:$0x75316420] }
  0x3c   : > { %867 = vst [vmem:[#allocation1] ss:$2 sm:$0xff] %v1708_v2  ;;  %v1515_v24 = vld [vmem:[%s1955_s0 + $0x28] sm:$0xf] }
  0x3f   : > { %v1021_v34 = vld.sshfl [vmem:[#allocation1 + $0x20] sm:$0xff pattern:$0x75316420] }
  0x40   : > { %1161 = vst [vmem:[#allocation1 + $0x20] ss:$2 sm:$0xff] %v1153_v33 }
  0x41   : > { %v874_v35 = vld.sshfl [vmem:[#allocation1 + $0x10] sm:$0xff pattern:$0x75316420]  ;;  %v875_v36 = vld.sshfl [vmem:[#allocation1 + $0x18] sm:$0xff pattern:$0x75316420] }
  0x42   : > { %736 = vrot.lane.b32.xlu0 %v729_v29, %s1667_s18  ;;  %738 = vrot.lane.b32.xlu1 %v730_v30, %s1667_s18  ;;  %1014 = vst [vmem:[#allocation1 + $0x10] ss:$2 sm:$0xff] %v1705_v1  ;;  %v1516_v30 = vld [vmem:[%s1955_s0 + $0x30] sm:$0xff] }
  0x43   : > { %589 = vrot.lane.b32.xlu2 %v583_v26, %s1666_s17  ;;  %v873_v37 = vld.sshfl [vmem:[#allocation1 + $0x8] sm:$0xff pattern:$0x75316420]  ;;  %v872_v38 = vld.sshfl [vmem:[#allocation1] sm:$0xff pattern:$0x75316420] }
  0x44   : > { %1012 = vst [vmem:[#allocation1] ss:$2 sm:$0xff] %v1708_v2 }
  0x47   : > { %v1166_v40 = vld.sshfl [vmem:[#allocation1 + $0x20] sm:$0xff pattern:$0x75316420] }
  0x48   : > { %1306 = vst [vmem:[#allocation1 + $0x20] ss:$2 sm:$0xff] %v1298_v39 }
  0x49   : > { %v1019_v41 = vld.sshfl [vmem:[#allocation1 + $0x10] sm:$0xff pattern:$0x75316420]  ;;  %v1020_v42 = vld.sshfl [vmem:[#allocation1 + $0x18] sm:$0xff pattern:$0x75316420] }
  0x4a   : > { %734 = vrot.lane.b32.xlu1 %v728_v31, %s1667_s18  ;;  %732 = vrot.lane.b32.xlu0 %v727_v32, %s1667_s18  ;;  %1159 = vst [vmem:[#allocation1 + $0x10] ss:$2 sm:$0xff] %v1705_v1 }
  0x4b   : > { %740 = vrot.lane.b32.xlu2 %v731_v22, %s1667_s18  ;;  %v1017_v43 = vld.sshfl [vmem:[#allocation1] sm:$0xff pattern:$0x75316420]  ;;  %v1018_v44 = vld.sshfl [vmem:[#allocation1 + $0x8] sm:$0xff pattern:$0x75316420] }
  0x4c   : > { %1157 = vst [vmem:[#allocation1] ss:$2 sm:$0xff] %v1708_v2 }
  0x4f   : > { %v1311_v50 = vld.sshfl [vmem:[#allocation1 + $0x20] sm:$0xff pattern:$0x75316420] }
  0x51   : > { %v1164_v45 = vld.sshfl [vmem:[#allocation1 + $0x10] sm:$0xff pattern:$0x75316420]  ;;  %v1165_v46 = vld.sshfl [vmem:[#allocation1 + $0x18] sm:$0xff pattern:$0x75316420] }
  0x52   : > { %883 = vrot.lane.b32.xlu0 %v875_v36, %s1668_s19  ;;  %885 = vrot.lane.b32.xlu1 %v876_v28, %s1668_s19  ;;  %1304 = vst [vmem:[#allocation1 + $0x10] ss:$2 sm:$0xff] %v1705_v1  ;;  %v1517_v36 = vld [vmem:[%s1955_s0 + $0x38] sm:$0xf] }
  0x53   : > { %881 = vrot.lane.b32.xlu2 %v874_v35, %s1668_s19  ;;  %v1163_v47 = vld.sshfl [vmem:[#allocation1 + $0x8] sm:$0xff pattern:$0x75316420]  ;;  %v1162_v48 = vld.sshfl [vmem:[#allocation1] sm:$0xff pattern:$0x75316420] }
  0x54   : > { %1302 = vst [vmem:[#allocation1] ss:$2 sm:$0xff] %v1708_v2 }
  0x59   : > { %v1310_v49 = vld.sshfl [vmem:[#allocation1 + $0x18] sm:$0xff pattern:$0x75316420]  ;;  %v1309_v54 = vld.sshfl [vmem:[#allocation1 + $0x10] sm:$0xff pattern:$0x75316420] }
  0x5a   : > { %879 = vrot.lane.b32.xlu0 %v873_v37, %s1668_s19  ;;  %1026 = vrot.lane.b32.xlu1 %v1019_v41, %s1669_s20 }
  0x5b   : > { %877 = vrot.lane.b32.xlu2 %v872_v38, %s1668_s19  ;;  %v1308_v52 = vld.sshfl [vmem:[#allocation1 + $0x8] sm:$0xff pattern:$0x75316420]  ;;  %v1307_v60 = vld.sshfl [vmem:[#allocation1] sm:$0xff pattern:$0x75316420] }
  0x62   : > { %1030 = vrot.lane.b32.xlu0 %v1021_v34, %s1669_s20  ;;  %1022 = vrot.lane.b32.xlu1 %v1017_v43, %s1669_s20 }
  0x63   : > { %1028 = vrot.lane.b32.xlu2 %v1020_v42, %s1669_s20  ;;  %v1518_v42 = vld [vmem:[%s1955_s0 + $0x40] sm:$0xff] }
  0x6a   : > { %1171 = vrot.lane.b32.xlu0 %v1164_v45, %s1670_s21  ;;  %1173 = vrot.lane.b32.xlu1 %v1165_v46, %s1670_s21 }
  0x6b   : > { %1024 = vrot.lane.b32.xlu2 %v1018_v44, %s1669_s20 }
  0x72   : > { %1169 = vrot.lane.b32.xlu1 %v1163_v47, %s1670_s21  ;;  %1167 = vrot.lane.b32.xlu0 %v1162_v48, %s1670_s21  ;;  %v1519_v48 = vld [vmem:[%s1955_s0 + $0x48] sm:$0xf] }
  0x73   : > { %1175 = vrot.lane.b32.xlu2 %v1166_v40, %s1670_s21 }
  0x75   : > { %v191_v51 = vpop.permute.xlu2 %190 }
  0x7a   : > { %1318 = vrot.lane.b32.xlu0 %v1310_v49, %s1671_s22  ;;  %1320 = vrot.lane.b32.xlu1 %v1311_v50, %s1671_s22 }
  0x7b   : > { %1316 = vrot.lane.b32.xlu2 %v1309_v54, %s1671_s22  ;;  %v1520_v54 = vld [vmem:[%s1955_s0 + $0x50] sm:$0xff] }
  0x82   : > { %1314 = vrot.lane.b32.xlu0 %v1308_v52, %s1671_s22 }
  0x83   : > { %1312 = vrot.lane.b32.xlu2 %v1307_v60, %s1671_s22 }
  0x84   : > { %v447_v53 = vpop.permute.xlu2 %446 }
  0x8a   : > { %v197_v55 = vpop.permute.xlu1 %196 }
  0x8b   : > { %v193_v56 = vpop.permute.xlu0 %192 }
  0x8c   : > { %v200_v58 = vsel %vm198_vm0, %v191_v51, %v193_v56 }
  0x8d   : > { %1531 = vmatpush.msk.msra.mxu1 %vm210_vm1, %v200_v58  ;;  %v443_v59 = vpop.permute.xlu2 %442  ;;  %v1521_v58 = vld [vmem:[%s1955_s0 + $0x58] sm:$0xf] }
  0x8e   : > { %1532 = vmatmul.msk.f32.vlgmr.msra.gmra.mxu1 %vm203_vm2, %v1512_v57 }
  0x8f   : > { %1543 = vmatpush.msk.msrb.mxu1 %vm210_vm1, %v1723_v14 }
  0x92   : > { %v189_v61 = vpop.permute.xlu1 %188 }
  0x93   : > { %v195_v62 = vpop.permute.xlu0 %194  ;;  %v199_v63 = vsel %vm198_vm0, %v189_v61, %v191_v51 }
  0x94   : > { %1528 = vmatpush.msk.msra.mxu0 %vm210_vm1, %v199_v63  ;;  %v201_v1 = vsel %vm198_vm0, %v193_v56, %v195_v62  ;;  %v202_v2 = vsel %vm198_vm0, %v195_v62, %v197_v55 }
  0x95   : > { %1534 = vmatpush.msk.msra.mxu2 %vm210_vm1, %v201_v1  ;;  %1537 = vmatpush.msk.msra.mxu3 %vm210_vm1, %v202_v2  ;;  %v594_v3 = vpop.permute.xlu2 %593  ;;  %v1522_v2 = vld [vmem:[%s1955_s0 + $0x60] sm:$0xff] }
  0x96   : > { %1529 = vmatmul.msk.f32.vlgmr.msra.gmra.mxu0 %vm203_vm2, %v1512_v57  ;;  %1533 = vmatmul.msk.f32.gmra.mxu1 %vm203_vm2, %v1513_v0 }
  0x97   : > { %1535 = vmatmul.msk.f32.vlgmr.msra.gmra.mxu2 %vm203_vm2, %v1512_v57  ;;  %1538 = vmatmul.msk.f32.vlgmr.msra.gmra.mxu3 %vm203_vm2, %v1512_v57 }
  0x98   : > { %1546 = vmatpush.msk.msrb.mxu2 %vm210_vm1, %v1716_v11  ;;  %1549 = vmatpush.msk.msrb.mxu3 %vm210_vm1, %v1718_v12  ;;  %v145_v11 = vld [vmem:[%s1955_s0 + $0x8] sm:$0xf] }
  0x99   : > { %1540 = vmatpush.msk.msrb.mxu0 %vm210_vm1, %v1721_v13 }
  0x9a   : > { %v451_v4 = vpop.permute.xlu1 %450 }
  0x9c   : > { %v449_v6 = vpop.permute.xlu0 %448 }
  0x9d   : > { %v455_v7 = vsel %vm452_vm3, %v447_v53, %v449_v6  ;;  %v456_v8 = vsel %vm452_vm3, %v449_v6, %v451_v4  ;;  %v590_v9 = vpop.permute.xlu2 %589  ;;  %v1523_v6 = vld [vmem:[%s1955_s0 + $0x68] sm:$0xf] }
  0x9e   : > { %1530 = vmatmul.msk.f32.gmra.mxu0 %vm203_vm2, %v1513_v0  ;;  %1544 = vmatmul.msk.f32.vlgmr.msrb.gmra.mxu1 %vm203_vm2, %v144_v5 }
  0x9f   : > { %1536 = vmatmul.msk.f32.gmra.mxu2 %vm203_vm2, %v1513_v0  ;;  %1539 = vmatmul.msk.f32.gmra.mxu3 %vm203_vm2, %v1513_v0 }
  0xa0   : > { %1558 = vmatpush.msk.msra.mxu2 %vm210_vm1, %v455_v7  ;;  %1561 = vmatpush.msk.msra.mxu3 %vm210_vm1, %v456_v8 }
  0xa4   : > { %v445_v10 = vpop.permute.xlu0 %444  ;;  %v592_v12 = vpop.permute.xlu1 %591 }
  0xa5   : > { %v453_v13 = vsel %vm452_vm3, %v443_v59, %v445_v10  ;;  %v454_v14 = vsel %vm452_vm3, %v445_v10, %v447_v53  ;;  %v741_v15 = vpop.permute.xlu2 %740  ;;  %v600_v16 = vsel %vm597_vm4, %v592_v12, %v594_v3  ;;  %v599_v17 = vsel %vm597_vm4, %v590_v9, %v592_v12  ;;  %v1524_v12 = vld [vmem:[%s1955_s0 + $0x70] sm:$0xff] }
  0xa6   : > { %1555 = vmatpush.msk.msra.mxu1 %vm210_vm1, %v454_v14  ;;  %1541 = vmatmul.msk.f32.vlgmr.msrb.gmra.mxu0 %vm203_vm2, %v144_v5 }
  0xa7   : > { %1545 = vmatmul.msk.f32.gmra.mxu1 %vm203_vm2, %v145_v11  ;;  %1547 = vmatmul.msk.f32.vlgmr.msrb.gmra.mxu2 %vm203_vm2, %v144_v5 }
  0xa8   : > { %1550 = vmatmul.msk.f32.vlgmr.msrb.gmra.mxu3 %vm203_vm2, %v144_v5  ;;  %1552 = vmatpush.msk.msra.mxu0 %vm210_vm1, %v453_v13  ;;  %v1525_v13 = vld [vmem:[%s1955_s0 + $0x78] sm:$0xf] }
  0xa9   : > { %1567 = vmatpush.msk.msrb.mxu1 %vm210_vm1, %v599_v17  ;;  %1570 = vmatpush.msk.msrb.mxu2 %vm210_vm1, %v600_v16 }
  0xac   : > { %v596_v19 = vpop.permute.xlu0 %595  ;;  %v588_v20 = vpop.permute.xlu1 %587 }
  0xad   : > { %v601_v21 = vsel %vm597_vm4, %v594_v3, %v596_v19  ;;  %v598_v22 = vsel %vm597_vm4, %v588_v20, %v590_v9  ;;  %v882_v23 = vpop.permute.xlu2 %881 }
  0xae   : > { %1542 = vmatmul.msk.f32.gmra.mxu0 %vm203_vm2, %v145_v11  ;;  %1573 = vmatpush.msk.msrb.mxu3 %vm210_vm1, %v601_v21 }
  0xaf   : > { %1548 = vmatmul.msk.f32.gmra.mxu2 %vm203_vm2, %v145_v11  ;;  %1556 = vmatmul.msk.f32.vlgmr.msra.gmra.mxu1 %vm203_vm2, %v1514_v18 }
  0xb0   : > { %1551 = vmatmul.msk.f32.gmra.mxu3 %vm203_vm2, %v145_v11  ;;  %1564 = vmatpush.msk.msrb.mxu0 %vm210_vm1, %v598_v22 }
  0xb4   : > { %v737_v25 = vpop.permute.xlu0 %736  ;;  %v739_v26 = vpop.permute.xlu1 %738 }
  0xb5   : > { %v745_v27 = vsel %vm742_vm5, %v737_v25, %v739_v26  ;;  %v746_v28 = vsel %vm742_vm5, %v739_v26, %v741_v15  ;;  %v878_v29 = vpop.permute.xlu2 %877  ;;  %v1526_v15 = vld [vmem:[%s1955_s0 + $0x80] sm:$0xff] }
  0xb6   : > { %1553 = vmatmul.msk.f32.vlgmr.msra.gmra.mxu0 %vm203_vm2, %v1514_v18 }
  0xb7   : > { %1557 = vmatmul.msk.f32.gmra.mxu1 %vm203_vm2, %v1515_v24  ;;  %1559 = vmatmul.msk.f32.vlgmr.msra.gmra.mxu2 %vm203_vm2, %v1514_v18 }
  0xb8   : > { %1562 = vmatmul.msk.f32.vlgmr.msra.gmra.mxu3 %vm203_vm2, %v1514_v18  ;;  %1582 = vmatpush.msk.msra.mxu2 %vm210_vm1, %v745_v27  ;;  %v1527_v18 = vld [vmem:[%s1955_s0 + $0x88] sm:$0xf] }
  0xb9   : > { %1585 = vmatpush.msk.msra.mxu3 %vm210_vm1, %v746_v28 }
  0xbc   : > { %v735_v31 = vpop.permute.xlu1 %734  ;;  %v733_v32 = vpop.permute.xlu0 %732 }
  0xbd   : > { %v744_v33 = vsel %vm742_vm5, %v735_v31, %v737_v25  ;;  %v743_v34 = vsel %vm742_vm5, %v733_v32, %v735_v31  ;;  %v1029_v35 = vpop.permute.xlu2 %1028 }
  0xbe   : > { %1554 = vmatmul.msk.f32.gmra.mxu0 %vm203_vm2, %v1515_v24  ;;  %1579 = vmatpush.msk.msra.mxu1 %vm210_vm1, %v744_v33 }
  0xbf   : > { %1560 = vmatmul.msk.f32.gmra.mxu2 %vm203_vm2, %v1515_v24  ;;  %1568 = vmatmul.msk.f32.vlgmr.msrb.gmra.mxu1 %vm203_vm2, %v1516_v30 }
  0xc0   : > { %1563 = vmatmul.msk.f32.gmra.mxu3 %vm203_vm2, %v1515_v24  ;;  %1576 = vmatpush.msk.msra.mxu0 %vm210_vm1, %v743_v34 }
  0xc4   : > { %v884_v37 = vpop.permute.xlu0 %883  ;;  %v886_v38 = vpop.permute.xlu1 %885 }
  0xc5   : > { %v890_v39 = vsel %vm887_vm6, %v882_v23, %v884_v37  ;;  %v891_v40 = vsel %vm887_vm6, %v884_v37, %v886_v38  ;;  %v1025_v41 = vpop.permute.xlu2 %1024 }
  0xc6   : > { %1565 = vmatmul.msk.f32.vlgmr.msrb.gmra.mxu0 %vm203_vm2, %v1516_v30 }
  0xc7   : > { %1569 = vmatmul.msk.f32.gmra.mxu1 %vm203_vm2, %v1517_v36  ;;  %1571 = vmatmul.msk.f32.vlgmr.msrb.gmra.mxu2 %vm203_vm2, %v1516_v30 }
  0xc8   : > { %1574 = vmatmul.msk.f32.vlgmr.msrb.gmra.mxu3 %vm203_vm2, %v1516_v30  ;;  %1594 = vmatpush.msk.msrb.mxu2 %vm210_vm1, %v890_v39 }
  0xc9   : > { %1597 = vmatpush.msk.msrb.mxu3 %vm210_vm1, %v891_v40 }
  0xcc   : > { %v880_v43 = vpop.permute.xlu0 %879  ;;  %v1027_v44 = vpop.permute.xlu1 %1026 }
  0xcd   : > { %v889_v45 = vsel %vm887_vm6, %v880_v43, %v882_v23  ;;  %v888_v46 = vsel %vm887_vm6, %v878_v29, %v880_v43  ;;  %v1034_v47 = vsel %vm1032_vm7, %v1025_v41, %v1027_v44  ;;  %v1035_v51 = vsel %vm1032_vm7, %v1027_v44, %v1029_v35  ;;  %v1176_v57 = vpop.permute.xlu2 %1175 }
  0xce   : > { %1566 = vmatmul.msk.f32.gmra.mxu0 %vm203_vm2, %v1517_v36  ;;  %1591 = vmatpush.msk.msrb.mxu1 %vm210_vm1, %v889_v45 }
  0xcf   : > { %1572 = vmatmul.msk.f32.gmra.mxu2 %vm203_vm2, %v1517_v36  ;;  %1580 = vmatmul.msk.f32.vlgmr.msra.gmra.mxu1 %vm203_vm2, %v1518_v42 }
  0xd0   : > { %1575 = vmatmul.msk.f32.gmra.mxu3 %vm203_vm2, %v1517_v36  ;;  %1588 = vmatpush.msk.msrb.mxu0 %vm210_vm1, %v888_v46 }
  0xd1   : > { %1603 = vmatpush.msk.msra.mxu1 %vm210_vm1, %v1034_v47 }
  0xd4   : > { %v1031_v49 = vpop.permute.xlu0 %1030  ;;  %v1023_v50 = vpop.permute.xlu1 %1022 }
  0xd5   : > { %v1036_v52 = vsel %vm1032_vm7, %v1029_v35, %v1031_v49  ;;  %v1033_v53 = vsel %vm1032_vm7, %v1023_v50, %v1025_v41  ;;  %v1317_v1 = vpop.permute.xlu2 %1316 }
  0xd6   : > { %1577 = vmatmul.msk.f32.vlgmr.msra.gmra.mxu0 %vm203_vm2, %v1518_v42 }
  0xd7   : > { %1581 = vmatmul.msk.f32.gmra.mxu1 %vm203_vm2, %v1519_v48  ;;  %1583 = vmatmul.msk.f32.vlgmr.msra.gmra.mxu2 %vm203_vm2, %v1518_v42 }
  0xd8   : > { %1586 = vmatmul.msk.f32.vlgmr.msra.gmra.mxu3 %vm203_vm2, %v1518_v42  ;;  %1606 = vmatpush.msk.msra.mxu2 %vm210_vm1, %v1035_v51 }
  0xd9   : > { %1609 = vmatpush.msk.msra.mxu3 %vm210_vm1, %v1036_v52  ;;  %1600 = vmatpush.msk.msra.mxu0 %vm210_vm1, %v1033_v53 }
  0xdc   : > { %v1172_v55 = vpop.permute.xlu0 %1171  ;;  %v1174_v56 = vpop.permute.xlu1 %1173 }
  0xdd   : > { %v1180_v61 = vsel %vm1177_vm8, %v1172_v55, %v1174_v56  ;;  %v1181_v63 = vsel %vm1177_vm8, %v1174_v56, %v1176_v57  ;;  %v1313_v5 = vpop.permute.xlu2 %1312 }
  0xde   : > { %1578 = vmatmul.msk.f32.gmra.mxu0 %vm203_vm2, %v1519_v48 }
  0xdf   : > { %1584 = vmatmul.msk.f32.gmra.mxu2 %vm203_vm2, %v1519_v48  ;;  %1592 = vmatmul.msk.f32.vlgmr.msrb.gmra.mxu1 %vm203_vm2, %v1520_v54 }
  0xe0   : > { %1587 = vmatmul.msk.f32.gmra.mxu3 %vm203_vm2, %v1519_v48 }
  0xe4   : > { %v1170_v59 = vpop.permute.xlu1 %1169  ;;  %v1168_v60 = vpop.permute.xlu0 %1167 }
  0xe5   : > { %v1179_v62 = vsel %vm1177_vm8, %v1170_v59, %v1172_v55  ;;  %v1178_v0 = vsel %vm1177_vm8, %v1168_v60, %v1170_v59 }
  0xe6   : > { %1589 = vmatmul.msk.f32.vlgmr.msrb.gmra.mxu0 %vm203_vm2, %v1520_v54  ;;  %1615 = vmatpush.msk.msrb.mxu1 %vm210_vm1, %v1179_v62 }
  0xe7   : > { %1593 = vmatmul.msk.f32.gmra.mxu1 %vm203_vm2, %v1521_v58  ;;  %1595 = vmatmul.msk.f32.vlgmr.msrb.gmra.mxu2 %vm203_vm2, %v1520_v54 }
  0xe8   : > { %1598 = vmatmul.msk.f32.vlgmr.msrb.gmra.mxu3 %vm203_vm2, %v1520_v54  ;;  %1618 = vmatpush.msk.msrb.mxu2 %vm210_vm1, %v1180_v61 }
  0xe9   : > { %1621 = vmatpush.msk.msrb.mxu3 %vm210_vm1, %v1181_v63  ;;  %1612 = vmatpush.msk.msrb.mxu0 %vm210_vm1, %v1178_v0 }
  0xec   : > { %v1319_v3 = vpop.permute.xlu0 %1318  ;;  %v1321_v4 = vpop.permute.xlu1 %1320 }
  0xed   : > { %v1325_v8 = vsel %vm1322_vm9, %v1317_v1, %v1319_v3  ;;  %v1326_v10 = vsel %vm1322_vm9, %v1319_v3, %v1321_v4 }
  0xee   : > { %1590 = vmatmul.msk.f32.gmra.mxu0 %vm203_vm2, %v1521_v58 }
  0xef   : > { %1596 = vmatmul.msk.f32.gmra.mxu2 %vm203_vm2, %v1521_v58  ;;  %1604 = vmatmul.msk.f32.vlgmr.msra.gmra.mxu1 %vm203_vm2, %v1522_v2 }
  0xf0   : > { %1599 = vmatmul.msk.f32.gmra.mxu3 %vm203_vm2, %v1521_v58 }
  0xf4   : > { %v1315_v7 = vpop.permute.xlu0 %1314 }
  0xf5   : > { %v1324_v9 = vsel %vm1322_vm9, %v1315_v7, %v1317_v1  ;;  %v1323_v11 = vsel %vm1322_vm9, %v1313_v5, %v1315_v7 }
  0xf6   : > { %1601 = vmatmul.msk.f32.vlgmr.msra.gmra.mxu0 %vm203_vm2, %v1522_v2  ;;  %1627 = vmatpush.msk.msra.mxu1 %vm210_vm1, %v1324_v9 }
  0xf7   : > { %1605 = vmatmul.msk.f32.gmra.mxu1 %vm203_vm2, %v1523_v6  ;;  %1607 = vmatmul.msk.f32.vlgmr.msra.gmra.mxu2 %vm203_vm2, %v1522_v2 }
  0xf8   : > { %1610 = vmatmul.msk.f32.vlgmr.msra.gmra.mxu3 %vm203_vm2, %v1522_v2  ;;  %1630 = vmatpush.msk.msra.mxu2 %vm210_vm1, %v1325_v8 }
  0xf9   : > { %1633 = vmatpush.msk.msra.mxu3 %vm210_vm1, %v1326_v10  ;;  %1624 = vmatpush.msk.msra.mxu0 %vm210_vm1, %v1323_v11 }
  0xfe   : > { %1602 = vmatmul.msk.f32.gmra.mxu0 %vm203_vm2, %v1523_v6 }
  0xff   : > { %1608 = vmatmul.msk.f32.gmra.mxu2 %vm203_vm2, %v1523_v6  ;;  %1616 = vmatmul.msk.f32.vlgmr.msrb.gmra.mxu1 %vm203_vm2, %v1524_v12 }
 0x100   : > { %1611 = vmatmul.msk.f32.gmra.mxu3 %vm203_vm2, %v1523_v6 }
 0x106   : > { %1613 = vmatmul.msk.f32.vlgmr.msrb.gmra.mxu0 %vm203_vm2, %v1524_v12 }
 0x107   : > { %1617 = vmatmul.msk.f32.gmra.mxu1 %vm203_vm2, %v1525_v13  ;;  %1619 = vmatmul.msk.f32.vlgmr.msrb.gmra.mxu2 %vm203_vm2, %v1524_v12 }
 0x108   : > { %1622 = vmatmul.msk.f32.vlgmr.msrb.gmra.mxu3 %vm203_vm2, %v1524_v12 }
 0x10b   : > { %v259_v14 = vpop.f32.mrf.mxu1 }
 0x10e   : > { %1614 = vmatmul.msk.f32.gmra.mxu0 %vm203_vm2, %v1525_v13 }
 0x10f   : > { %1620 = vmatmul.msk.f32.gmra.mxu2 %vm203_vm2, %v1525_v13  ;;  %1628 = vmatmul.msk.f32.vlgmr.msra.gmra.mxu1 %vm203_vm2, %v1526_v15 }
 0x110   : > { %1623 = vmatmul.msk.f32.gmra.mxu3 %vm203_vm2, %v1525_v13 }
 0x113   : > { %v236_v16 = vpop.f32.mrf.mxu0  ;;  %v262_v17 = vpop.f32.mrf.mxu1 }
 0x116   : > { %1625 = vmatmul.msk.f32.vlgmr.msra.gmra.mxu0 %vm203_vm2, %v1526_v15 }
 0x117   : > { %1629 = vmatmul.msk.f32.gmra.mxu1 %vm203_vm2, %v1527_v18  ;;  %1631 = vmatmul.msk.f32.vlgmr.msra.gmra.mxu2 %vm203_vm2, %v1526_v15 }
 0x118   : > { %1634 = vmatmul.msk.f32.vlgmr.msra.gmra.mxu3 %vm203_vm2, %v1526_v15 }
 0x11a   : > { %v282_v19 = vpop.f32.mrf.mxu2  ;;  %v305_v20 = vpop.f32.mrf.mxu3 }
 0x11b   : > { %v239_v21 = vpop.f32.mrf.mxu0  ;;  %v374_v22 = vpop.f32.mrf.mxu1 }
 0x11c   : > { %v375_v23 = vadd.f32 %v374_v22, %v259_v14 }
 0x11e   : > { %1626 = vmatmul.msk.f32.gmra.mxu0 %vm203_vm2, %v1527_v18 }
 0x11f   : > { %1632 = vmatmul.msk.f32.gmra.mxu2 %vm203_vm2, %v1527_v18 }
 0x120   : > { %1635 = vmatmul.msk.f32.gmra.mxu3 %vm203_vm2, %v1527_v18 }
 0x122   : > { %v285_v24 = vpop.f32.mrf.mxu2  ;;  %v308_v25 = vpop.f32.mrf.mxu3 }
 0x123   : > { %v351_v26 = vpop.f32.mrf.mxu0 }
 0x124   : > { %v352_v27 = vadd.f32 %v351_v26, %v236_v16  ;;  %v377_v28 = vpop.f32.mrf.mxu1 }
 0x125   : > { %v378_v29 = vadd.f32 %v377_v28, %v262_v17 }
 0x12a   : > { %v397_v30 = vpop.f32.mrf.mxu2 }
 0x12b   : > { %v398_v31 = vadd.f32 %v397_v30, %v282_v19  ;;  %v420_v32 = vpop.f32.mrf.mxu3  ;;  %v354_v33 = vpop.f32.mrf.mxu0 }
 0x12c   : > { %v421_v34 = vadd.f32 %v420_v32, %v305_v20  ;;  %v355_v35 = vadd.f32 %v354_v33, %v239_v21  ;;  %v511_v36 = vpop.f32.mrf.mxu1 }
 0x12d   : > { %v564_v37 = vadd.f32 %v511_v36, %v375_v23 }
 0x132   : > { %v400_v38 = vpop.f32.mrf.mxu2 }
 0x133   : > { %v401_v39 = vadd.f32 %v400_v38, %v285_v24  ;;  %v423_v40 = vpop.f32.mrf.mxu3  ;;  %v488_v41 = vpop.f32.mrf.mxu0 }
 0x134   : > { %v424_v42 = vadd.f32 %v423_v40, %v308_v25  ;;  %v563_v43 = vadd.f32 %v488_v41, %v352_v27  ;;  %v514_v44 = vpop.f32.mrf.mxu1 }
 0x135   : > { %v568_v45 = vadd.f32 %v514_v44, %v378_v29 }
 0x13a   : > { %v534_v46 = vpop.f32.mrf.mxu2 }
 0x13b   : > { %v565_v47 = vadd.f32 %v534_v46, %v398_v31  ;;  %v557_v48 = vpop.f32.mrf.mxu3  ;;  %v491_v49 = vpop.f32.mrf.mxu0 }
 0x13c   : > { %v566_v50 = vadd.f32 %v557_v48, %v421_v34  ;;  %v567_v51 = vadd.f32 %v491_v49, %v355_v35  ;;  %v656_v52 = vpop.f32.mrf.mxu1 }
 0x13d   : > { %v709_v53 = vadd.f32 %v656_v52, %v564_v37 }
 0x142   : > { %v537_v54 = vpop.f32.mrf.mxu2 }
 0x143   : > { %v569_v55 = vadd.f32 %v537_v54, %v401_v39  ;;  %v560_v56 = vpop.f32.mrf.mxu3  ;;  %v633_v57 = vpop.f32.mrf.mxu0 }
 0x144   : > { %v570_v58 = vadd.f32 %v560_v56, %v424_v42  ;;  %v708_v59 = vadd.f32 %v633_v57, %v563_v43  ;;  %v659_v60 = vpop.f32.mrf.mxu1 }
 0x145   : > { %v713_v61 = vadd.f32 %v659_v60, %v568_v45 }
 0x14a   : > { %v679_v62 = vpop.f32.mrf.mxu2 }
 0x14b   : > { %v710_v63 = vadd.f32 %v679_v62, %v565_v47  ;;  %v702_v0 = vpop.f32.mrf.mxu3  ;;  %v636_v1 = vpop.f32.mrf.mxu0 }
 0x14c   : > { %v711_v2 = vadd.f32 %v702_v0, %v566_v50  ;;  %v712_v3 = vadd.f32 %v636_v1, %v567_v51  ;;  %v801_v4 = vpop.f32.mrf.mxu1 }
 0x14d   : > { %v854_v35 = vadd.f32 %v801_v4, %v709_v53 }
 0x152   : > { %v682_v5 = vpop.f32.mrf.mxu2 }
 0x153   : > { %v1929_v6 = vadd.f32 %v682_v5, %v569_v55  ;;  %v705_v7 = vpop.f32.mrf.mxu3  ;;  %v778_v8 = vpop.f32.mrf.mxu0 }
 0x154   : > { %v1931_v9 = vadd.f32 %v705_v7, %v570_v58  ;;  %v804_v10 = vpop.f32.mrf.mxu1  ;;  %v853_v42 = vadd.f32 %v778_v8, %v708_v59 }
 0x155   : > { %v858_v44 = vadd.f32 %v804_v10, %v713_v61 }
 0x15a   : > { %v824_v11 = vpop.f32.mrf.mxu2 }
 0x15b   : > { %v847_v12 = vpop.f32.mrf.mxu3  ;;  %v781_v13 = vpop.f32.mrf.mxu0  ;;  %v855_v52 = vadd.f32 %v824_v11, %v710_v63 }
 0x15c   : > { %v946_v14 = vpop.f32.mrf.mxu1  ;;  %v856_v56 = vadd.f32 %v847_v12, %v711_v2  ;;  %v857_v57 = vadd.f32 %v781_v13, %v712_v3 }
 0x15d   : > { %v999_v36 = vadd.f32 %v946_v14, %v854_v35 }
 0x162   : > { %v827_v15 = vpop.f32.mrf.mxu2 }
 0x163   : > { %v1933_v16 = vpop.f32.mrf.mxu3  ;;  %v923_v17 = vpop.f32.mrf.mxu0  ;;  %v859_v2 = vadd.f32 %v827_v15, %v1929_v6 }
 0x164   : > { %v949_v18 = vpop.f32.mrf.mxu1  ;;  %v998_v46 = vadd.f32 %v923_v17, %v853_v42  ;;  %v860_v13 = vadd.f32 %v1933_v16, %v1931_v9 }
 0x165   : > { %v1003_v47 = vadd.f32 %v949_v18, %v858_v44 }
 0x16a   : > { %v969_v19 = vpop.f32.mrf.mxu2 }
 0x16b   : > { %v992_v20 = vpop.f32.mrf.mxu3  ;;  %v926_v21 = vpop.f32.mrf.mxu0  ;;  %v1000_v60 = vadd.f32 %v969_v19, %v855_v52 }
 0x16c   : > { %v1091_v22 = vpop.f32.mrf.mxu1  ;;  %v1001_v62 = vadd.f32 %v992_v20, %v856_v56  ;;  %v1002_v0 = vadd.f32 %v926_v21, %v857_v57 }
 0x16d   : > { %v1144_v37 = vadd.f32 %v1091_v22, %v999_v36 }
 0x172   : > { %v972_v23 = vpop.f32.mrf.mxu2 }
 0x173   : > { %v995_v24 = vpop.f32.mrf.mxu3  ;;  %v1068_v25 = vpop.f32.mrf.mxu0  ;;  %v1004_v18 = vadd.f32 %v972_v23, %v859_v2 }
 0x174   : > { %v1094_v26 = vpop.f32.mrf.mxu1  ;;  %v1143_v48 = vadd.f32 %v1068_v25, %v998_v46  ;;  %v1005_v19 = vadd.f32 %v995_v24, %v860_v13 }
 0x175   : > { %v1148_v49 = vadd.f32 %v1094_v26, %v1003_v47 }
 0x17a   : > { %v1114_v27 = vpop.f32.mrf.mxu2 }
 0x17b   : > { %v1137_v28 = vpop.f32.mrf.mxu3  ;;  %v1071_v29 = vpop.f32.mrf.mxu0  ;;  %v1145_v1 = vadd.f32 %v1114_v27, %v1000_v60 }
 0x17c   : > { %v1236_v30 = vpop.f32.mrf.mxu1  ;;  %v1146_v4 = vadd.f32 %v1137_v28, %v1001_v62  ;;  %v1147_v5 = vadd.f32 %v1071_v29, %v1002_v0 }
 0x17d   : > { %v1289_v39 = vadd.f32 %v1236_v30, %v1144_v37 }
 0x182   : > { %v1117_v31 = vpop.f32.mrf.mxu2 }
 0x183   : > { %v1140_v32 = vpop.f32.mrf.mxu3  ;;  %v1213_v33 = vpop.f32.mrf.mxu0  ;;  %v1149_v20 = vadd.f32 %v1117_v31, %v1004_v18 }
 0x184   : > { %v1239_v34 = vpop.f32.mrf.mxu1  ;;  %v1288_v50 = vadd.f32 %v1213_v33, %v1143_v48  ;;  %v1150_v21 = vadd.f32 %v1140_v32, %v1005_v19 }
 0x185   : > { %v1293_v53 = vadd.f32 %v1239_v34, %v1148_v49 }
 0x18a   : > { %v1259_v38 = vpop.f32.mrf.mxu2 }
 0x18b   : > { %v1282_v40 = vpop.f32.mrf.mxu3  ;;  %v1216_v41 = vpop.f32.mrf.mxu0  ;;  %v1290_v7 = vadd.f32 %v1259_v38, %v1145_v1 }
 0x18c   : > { %v1381_v43 = vpop.f32.mrf.mxu1  ;;  %v1291_v63 = vadd.f32 %v1282_v40, %v1146_v4  ;;  %v1292_v8 = vadd.f32 %v1216_v41, %v1147_v5 }
 0x18d   : > { %v1434_v45 = vadd.f32 %v1381_v43, %v1289_v39 }
 0x18f   : > { %1442 = vst [vmem:[%s1939_s8 + $0x8] sm:$0xff] %v1434_v45 }
 0x192   : > { %v1262_v51 = vpop.f32.mrf.mxu2 }
 0x193   : > { %v1285_v54 = vpop.f32.mrf.mxu3  ;;  %v1358_v55 = vpop.f32.mrf.mxu0  ;;  %v1294_v22 = vadd.f32 %v1262_v51, %v1149_v20 }
 0x194   : > { %v1433_v58 = vadd.f32 %v1358_v55, %v1288_v50  ;;  %v1384_v59 = vpop.f32.mrf.mxu1  ;;  %v1295_v25 = vadd.f32 %v1285_v54, %v1150_v21 }
 0x195   : > { %v1438_v61 = vadd.f32 %v1384_v59, %v1293_v53 }
 0x196   : > { %1441 = vst [vmem:[%s1939_s8] sm:$0xff] %v1433_v58 }
 0x197   : > { %1446 = vst [vmem:[%s1939_s8 + $0x28] sm:$0xf] %v1438_v61 }
 0x19a   : > { %v1404_v10 = vpop.f32.mrf.mxu2 }
 0x19b   : > { %v1435_v3 = vadd.f32 %v1404_v10, %v1290_v7  ;;  %v1427_v11 = vpop.f32.mrf.mxu3  ;;  %v1361_v12 = vpop.f32.mrf.mxu0 }
 0x19c   : > { %v1436_v14 = vadd.f32 %v1427_v11, %v1291_v63  ;;  %v1437_v17 = vadd.f32 %v1361_v12, %v1292_v8 }
 0x19d   : > { %1443 = vst [vmem:[%s1939_s8 + $0x10] sm:$0xff] %v1435_v3 }
 0x19e   : > { %1444 = vst [vmem:[%s1939_s8 + $0x18] sm:$0xff] %v1436_v14 }
 0x19f   : > { %1445 = vst [vmem:[%s1939_s8 + $0x20] sm:$0xf] %v1437_v17 }
 0x1a2   : > { %v1407_v6 = vpop.f32.mrf.mxu2 }
 0x1a3   : > { %v1439_v15 = vadd.f32 %v1407_v6, %v1294_v22  ;;  %v1430_v26 = vpop.f32.mrf.mxu3 }
 0x1a4   : > { %v1440_v27 = vadd.f32 %v1430_v26, %v1295_v25 }
 0x1a5   : > { %1447 = vst [vmem:[%s1939_s8 + $0x30] sm:$0xf] %v1439_v15 }
 0x1a6   : > { %1448 = vst [vmem:[%s1939_s8 + $0x38] sm:$0xf] %v1440_v27 }
 0x1a7 PF: > { %s12_s9 = sadd.s32 1, %s1662_s9  }
 0x1a8   : > { %p9_p4 = scmp.ge.s32.totalorder %s12_s9, 4  }
 0x1aa   :  { %11 = sbr.rel (!%p9_p4) target bundleno = 1 (0x1), region = 83 }

</bundles_post_ra>
